<compile_context>
chip_gen: v6e
topology: v6e:2x2x1
jax: 0.10.0
libtpu: 0.0.40
codegen_flags: <defaults>
</compile_context>

<pallas_src>
import jax
import jax.numpy as jnp
from jax.experimental import pallas as pl
from jax.experimental.pallas import tpu as pltpu


# --------------------------------------------------------------------------
# Kernel
# --------------------------------------------------------------------------
def _resblock_kernel(x_ref, w1_ref, w2_ref, s1_ref, b1_ref, s2_ref, b2_ref,
                     out_ref):
    # x_ref  : (nb, H, W*C)   lane-dense NHWC slabs (one block of images)
    # w*_ref : (3*W*C, W*C)   band (block-Toeplitz) conv weights
    # s*/b*  : (1, W*C)       folded BN scale / shift, tiled over W
    # out_ref: (nb, H, W*C)
    nb, H, WC = x_ref.shape
    mm_dtype = w1_ref.dtype

    s1 = s1_ref[...]
    b1 = b1_ref[...]
    s2 = s2_ref[...]
    b2 = b2_ref[...]

    x = x_ref[...].astype(jnp.float32)                    # (nb, H, WC)
    zrow = jnp.zeros((nb, 1, WC), jnp.float32)            # hoisted zero halo

    def conv(v, w_ref):
        # v: (nb, H, WC) f32.  Build (nb*H, 3*WC) = [row y-1 | row y | row y+1]
        # per image (zero rows at the H boundary; the W boundary is handled by
        # the zero blocks baked into the band weight) and run one MXU matmul.
        up = jnp.concatenate([zrow, v[:, :H - 1, :]], axis=1)   # x[y-1]
        dn = jnp.concatenate([v[:, 1:, :], zrow], axis=1)       # x[y+1]
        lhs = jnp.concatenate([up, v, dn], axis=2)              # (nb, H, 3*WC)
        lhs = lhs.reshape(nb * H, 3 * WC)                       # layout-free
        o = jnp.dot(lhs.astype(mm_dtype), w_ref[...],
                    preferred_element_type=jnp.float32)
        return o.reshape(nb, H, WC)

    # ---- conv1 + bn1 + relu ----
    o1 = jnp.maximum(conv(x, w1_ref) * s1 + b1, 0.0)

    # ---- conv2 + bn2 + residual add + relu (one lane-dense store) ----
    o2 = conv(o1, w2_ref) * s2 + b2
    out_ref[...] = jnp.maximum(o2 + x, 0.0).astype(out_ref.dtype)


# --------------------------------------------------------------------------
# Wrapper helpers
# --------------------------------------------------------------------------
def _band_weight(w_oihw, W, dtype):
    """Fold the kx taps + channel contraction of a 3x3 conv into a
    (3*W*C, W*C) block-Toeplitz matrix:
        Wbig[ky*W*C + xw*C + ci, x*C + co] = w[co, ci, ky, xw - x + 1]
    (zero outside the band -> W-direction 'same' padding is built in)."""
    C = w_oihw.shape[0]
    wk = jnp.transpose(w_oihw, (2, 3, 1, 0))              # (ky, kx, Cin, Cout)
    xw = jnp.arange(W)[:, None]                           # source column
    xx = jnp.arange(W)[None, :]                           # output column
    dx = xw - xx + 1                                      # kx, (W, W)
    valid = (dx >= 0) & (dx <= 2)
    dxc = jnp.clip(dx, 0, 2)
    sel = wk[:, dxc, :, :]                                # (3, W, W, Cin, Cout)
    sel = jnp.where(valid[None, :, :, None, None], sel, 0.0)
    big = jnp.transpose(sel, (0, 1, 3, 2, 4)).reshape(3 * W * C, W * C)
    return big.astype(dtype)


def _fold_bn(bn, eps, W):
    gamma, beta, mean, var = bn
    C = gamma.shape[0]
    scale = gamma / jnp.sqrt(var + eps)
    shift = beta - mean * scale
    # per-channel -> per (x*C + c) lane position
    return (jnp.tile(scale, W).reshape(1, W * C).astype(jnp.float32),
            jnp.tile(shift, W).reshape(1, W * C).astype(jnp.float32))


def residual_block_pallas(x_nchw, w1_oihw, w2_oihw, bn1, bn2, eps=1e-5,
                          matmul_dtype=jnp.float32, nb=None):
    """Forward pass of ResidualBlock.  x_nchw: (N, C, H, W) float32.

    matmul_dtype: set to jnp.bfloat16 on v6e/v7x to feed the MXU natively
    (f32 accumulation and f32 BN/ReLU math are kept either way)."""
    N, C, H, W = x_nchw.shape
    WC = W * C

    if nb is None:                       # images per grid step (more work/step)
        nb = next(d for d in (8, 4, 2, 1) if N % d == 0)
        nb = min(nb, N)
    assert N % nb == 0

    s1, b1 = _fold_bn(bn1, eps, W)
    s2, b2 = _fold_bn(bn2, eps, W)
    w1b = _band_weight(w1_oihw, W, matmul_dtype)
    w2b = _band_weight(w2_oihw, W, matmul_dtype)

    # NCHW -> lane-dense (N, H, W*C).  No spatial pre-padding needed.
    # TODO(synk): if the caller can supply NHWC directly, these transposes
    #             (extra HBM passes) disappear entirely.
    x = jnp.transpose(x_nchw, (0, 2, 3, 1)).reshape(N, H, WC)

    out_flat = pl.pallas_call(
        _resblock_kernel,
        out_shape=jax.ShapeDtypeStruct((N, H, WC), x.dtype),
        grid_spec=pltpu.PrefetchScalarGridSpec(
            num_scalar_prefetch=0,
            grid=(N // nb,),
            in_specs=[
                pl.BlockSpec((nb, H, WC), lambda n: (n, 0, 0)),
                pl.BlockSpec((3 * WC, WC), lambda n: (0, 0)),
                pl.BlockSpec((3 * WC, WC), lambda n: (0, 0)),
                pl.BlockSpec((1, WC), lambda n: (0, 0)),
                pl.BlockSpec((1, WC), lambda n: (0, 0)),
                pl.BlockSpec((1, WC), lambda n: (0, 0)),
                pl.BlockSpec((1, WC), lambda n: (0, 0)),
            ],
            out_specs=pl.BlockSpec((nb, H, WC), lambda n: (n, 0, 0)),
        ),
        # TODO(synk): for real ResNet sizes (C>=128, H=W>=56) tile H into row
        #             strips (extra grid axis) and set vmem_limit_bytes for
        #             v7x's smaller VMEM.
        compiler_params=pltpu.CompilerParams(dimension_semantics=("parallel",)),
    )(x, w1b, w2b, s1, b1, s2, b2)

    out = out_flat.reshape(N, H, W, C)
    return jnp.transpose(out, (0, 3, 1, 2))               # back to NCHW


# --------------------------------------------------------------------------
# Pure-JAX reference (lax conv, NCHW) for correctness checking
# --------------------------------------------------------------------------
def residual_block_reference(x_nchw, w1_oihw, w2_oihw, bn1, bn2, eps=1e-5):
    def conv(x, w):
        return jax.lax.conv_general_dilated(
            x, w, window_strides=(1, 1), padding=((1, 1), (1, 1)),
            dimension_numbers=('NCHW', 'OIHW', 'NCHW'))

    def bn(x, p):
        g, b, m, v = p
        g, b, m, v = (a[None, :, None, None] for a in (g, b, m, v))
        return (x - m) / jnp.sqrt(v + eps) * g + b

    out = jax.nn.relu(bn(conv(x_nchw, w1_oihw), bn1))
    out = bn(conv(out, w2_oihw), bn2)
    return jax.nn.relu(out + x_nchw)


if __name__ == "__main__":
    N, C, H, W = 2, 8, 16, 16      # num_filters = 8 ; W*C = 128 (lane-dense)

    key = jax.random.PRNGKey(0)
    ks = jax.random.split(key, 11)

    x = jax.random.normal(ks[0], (N, C, H, W), jnp.float32)
    w1 = 0.1 * jax.random.normal(ks[1], (C, C, 3, 3), jnp.float32)   # OIHW
    w2 = 0.1 * jax.random.normal(ks[2], (C, C, 3, 3), jnp.float32)

    bn1 = (1.0 + 0.1 * jax.random.normal(ks[3], (C,), jnp.float32),   # gamma
           0.1 * jax.random.normal(ks[4], (C,), jnp.float32),         # beta
           0.1 * jax.random.normal(ks[5], (C,), jnp.float32),         # run mean
           1.0 + 0.5 * jax.random.uniform(ks[6], (C,), jnp.float32))  # run var
    bn2 = (1.0 + 0.1 * jax.random.normal(ks[7], (C,), jnp.float32),
           0.1 * jax.random.normal(ks[8], (C,), jnp.float32),
           0.1 * jax.random.normal(ks[9], (C,), jnp.float32),
           1.0 + 0.5 * jax.random.uniform(ks[10], (C,), jnp.float32))

    ref = jax.block_until_ready(residual_block_reference(x, w1, w2, bn1, bn2))

    # f32 MXU path (tight check vs. reference)
    out = jax.block_until_ready(residual_block_pallas(x, w1, w2, bn1, bn2))
    assert out.shape == (N, C, H, W) and out.dtype == jnp.float32
    assert jnp.allclose(out, ref, atol=1e-4, rtol=1e-4), \
        f"f32 max abs err = {jnp.max(jnp.abs(out - ref))}"

    # bf16 MXU-operand path (v6e/v7x fast path; f32 accumulation) — loose check
    out_bf = jax.block_until_ready(
        residual_block_pallas(x, w1, w2, bn1, bn2, matmul_dtype=jnp.bfloat16))
    assert jnp.allclose(out_bf, ref, atol=1e-1, rtol=1e-1), \
        f"bf16 max abs err = {jnp.max(jnp.abs(out_bf - ref))}"

    print("KERNEL_OK")
</pallas_src>

<mosaic_0001>
module attributes {stable_mosaic.version = 11 : i64} {
  func.func @_resblock_kernel(%arg0: i32, %arg1: memref<2x16x128xf32, #tpu.memory_space<vmem>>, %arg2: memref<384x128xf32, #tpu.memory_space<vmem>>, %arg3: memref<384x128xf32, #tpu.memory_space<vmem>>, %arg4: memref<1x128xf32, #tpu.memory_space<vmem>>, %arg5: memref<1x128xf32, #tpu.memory_space<vmem>>, %arg6: memref<1x128xf32, #tpu.memory_space<vmem>>, %arg7: memref<1x128xf32, #tpu.memory_space<vmem>>, %arg8: memref<2x16x128xf32, #tpu.memory_space<vmem>>) attributes {dimension_semantics = [#tpu.dimension_semantics<parallel>], iteration_bounds = array<i64: 1>, scalar_prefetch = 0 : i64, scratch_operands = 0 : i64, tpu.core_type = #tpu.core_type<tc>, window_params = [{transform_indices = @transform_0, window_bounds = array<i64: 2, 16, 128>}, {pipeline_mode = #tpu.pipeline_mode<synchronous>, transform_indices = @transform_1, window_bounds = array<i64: 384, 128>}, {pipeline_mode = #tpu.pipeline_mode<synchronous>, transform_indices = @transform_2, window_bounds = array<i64: 384, 128>}, {pipeline_mode = #tpu.pipeline_mode<synchronous>, transform_indices = @transform_3, window_bounds = array<i64: 1, 128>}, {pipeline_mode = #tpu.pipeline_mode<synchronous>, transform_indices = @transform_4, window_bounds = array<i64: 1, 128>}, {pipeline_mode = #tpu.pipeline_mode<synchronous>, transform_indices = @transform_5, window_bounds = array<i64: 1, 128>}, {pipeline_mode = #tpu.pipeline_mode<synchronous>, transform_indices = @transform_6, window_bounds = array<i64: 1, 128>}, {transform_indices = @transform_7, window_bounds = array<i64: 2, 16, 128>}]} {
    %c0 = arith.constant 0 : index
    %c0_0 = arith.constant 0 : index
    %0 = vector.load %arg4[%c0, %c0_0] : memref<1x128xf32, #tpu.memory_space<vmem>>, vector<1x128xf32>
    %c0_1 = arith.constant 0 : index
    %c0_2 = arith.constant 0 : index
    %1 = vector.load %arg5[%c0_1, %c0_2] : memref<1x128xf32, #tpu.memory_space<vmem>>, vector<1x128xf32>
    %c0_3 = arith.constant 0 : index
    %c0_4 = arith.constant 0 : index
    %2 = vector.load %arg6[%c0_3, %c0_4] : memref<1x128xf32, #tpu.memory_space<vmem>>, vector<1x128xf32>
    %c0_5 = arith.constant 0 : index
    %c0_6 = arith.constant 0 : index
    %3 = vector.load %arg7[%c0_5, %c0_6] : memref<1x128xf32, #tpu.memory_space<vmem>>, vector<1x128xf32>
    %c0_7 = arith.constant 0 : index
    %c0_8 = arith.constant 0 : index
    %c0_9 = arith.constant 0 : index
    %4 = vector.load %arg1[%c0_7, %c0_8, %c0_9] : memref<2x16x128xf32, #tpu.memory_space<vmem>>, vector<2x16x128xf32>
    %cst = arith.constant 0.000000e+00 : f32
    %5 = vector.broadcast %cst : f32 to vector<2x1x128xf32>
    %6 = vector.extract_strided_slice %4 {offsets = [0, 0, 0], sizes = [2, 15, 128], strides = [1, 1, 1]} : vector<2x16x128xf32> to vector<2x15x128xf32>
    %7 = tpu.concatenate %5, %6 in 1 : vector<2x1x128xf32>, vector<2x15x128xf32> -> vector<2x16x128xf32>
    %8 = vector.extract_strided_slice %4 {offsets = [0, 1, 0], sizes = [2, 15, 128], strides = [1, 1, 1]} : vector<2x16x128xf32> to vector<2x15x128xf32>
    %9 = tpu.concatenate %8, %5 in 1 : vector<2x15x128xf32>, vector<2x1x128xf32> -> vector<2x16x128xf32>
    %10 = tpu.concatenate %7, %4, %9 in 2 : vector<2x16x128xf32>, vector<2x16x128xf32>, vector<2x16x128xf32> -> vector<2x16x384xf32>
    %11 = vector.shape_cast %10 : vector<2x16x384xf32> to vector<32x384xf32>
    %c0_10 = arith.constant 0 : index
    %c0_11 = arith.constant 0 : index
    %12 = vector.load %arg2[%c0_10, %c0_11] : memref<384x128xf32, #tpu.memory_space<vmem>>, vector<384x128xf32>
    %cst_12 = arith.constant dense<0.000000e+00> : vector<32x128xf32>
    %13 = tpu.matmul %11, %12, %cst_12 {dimension_numbers = #tpu.dot_dimension_numbers<[1], [0], [0], [1], [0, 0, 1, 1], [], []>} : vector<32x384xf32>, vector<384x128xf32>, vector<32x128xf32> -> vector<32x128xf32>
    %14 = vector.shape_cast %13 : vector<32x128xf32> to vector<2x16x128xf32>
    %15 = vector.shape_cast %0 : vector<1x128xf32> to vector<1x1x128xf32>
    %16 = vector.broadcast %15 : vector<1x1x128xf32> to vector<2x16x128xf32>
    %17 = arith.mulf %14, %16 : vector<2x16x128xf32>
    %18 = vector.shape_cast %1 : vector<1x128xf32> to vector<1x1x128xf32>
    %19 = vector.broadcast %18 : vector<1x1x128xf32> to vector<2x16x128xf32>
    %20 = arith.addf %17, %19 : vector<2x16x128xf32>
    %cst_13 = arith.constant 0.000000e+00 : f32
    %21 = vector.broadcast %cst_13 : f32 to vector<2x16x128xf32>
    %22 = arith.maximumf %20, %21 : vector<2x16x128xf32>
    %23 = vector.extract_strided_slice %22 {offsets = [0, 0, 0], sizes = [2, 15, 128], strides = [1, 1, 1]} : vector<2x16x128xf32> to vector<2x15x128xf32>
    %24 = tpu.concatenate %5, %23 in 1 : vector<2x1x128xf32>, vector<2x15x128xf32> -> vector<2x16x128xf32>
    %25 = vector.extract_strided_slice %22 {offsets = [0, 1, 0], sizes = [2, 15, 128], strides = [1, 1, 1]} : vector<2x16x128xf32> to vector<2x15x128xf32>
    %26 = tpu.concatenate %25, %5 in 1 : vector<2x15x128xf32>, vector<2x1x128xf32> -> vector<2x16x128xf32>
    %27 = tpu.concatenate %24, %22, %26 in 2 : vector<2x16x128xf32>, vector<2x16x128xf32>, vector<2x16x128xf32> -> vector<2x16x384xf32>
    %28 = vector.shape_cast %27 : vector<2x16x384xf32> to vector<32x384xf32>
    %c0_14 = arith.constant 0 : index
    %c0_15 = arith.constant 0 : index
    %29 = vector.load %arg3[%c0_14, %c0_15] : memref<384x128xf32, #tpu.memory_space<vmem>>, vector<384x128xf32>
    %cst_16 = arith.constant dense<0.000000e+00> : vector<32x128xf32>
    %30 = tpu.matmul %28, %29, %cst_16 {dimension_numbers = #tpu.dot_dimension_numbers<[1], [0], [0], [1], [0, 0, 1, 1], [], []>} : vector<32x384xf32>, vector<384x128xf32>, vector<32x128xf32> -> vector<32x128xf32>
    %31 = vector.shape_cast %30 : vector<32x128xf32> to vector<2x16x128xf32>
    %32 = vector.shape_cast %2 : vector<1x128xf32> to vector<1x1x128xf32>
    %33 = vector.broadcast %32 : vector<1x1x128xf32> to vector<2x16x128xf32>
    %34 = arith.mulf %31, %33 : vector<2x16x128xf32>
    %35 = vector.shape_cast %3 : vector<1x128xf32> to vector<1x1x128xf32>
    %36 = vector.broadcast %35 : vector<1x1x128xf32> to vector<2x16x128xf32>
    %37 = arith.addf %34, %36 : vector<2x16x128xf32>
    %38 = arith.addf %37, %4 : vector<2x16x128xf32>
    %cst_17 = arith.constant 0.000000e+00 : f32
    %39 = vector.broadcast %cst_17 : f32 to vector<2x16x128xf32>
    %40 = arith.maximumf %38, %39 : vector<2x16x128xf32>
    %c0_18 = arith.constant 0 : index
    %c0_19 = arith.constant 0 : index
    %c0_20 = arith.constant 0 : index
    %41 = vector.load %arg8[%c0_18, %c0_19, %c0_20] : memref<2x16x128xf32, #tpu.memory_space<vmem>>, vector<2x16x128xf32>
    tpu.vector_store %arg8[%c0_18, %c0_19, %c0_20], %40 {strides = array<i32>} : memref<2x16x128xf32, #tpu.memory_space<vmem>>, vector<2x16x128xf32>,
    return
  }
  func.func @transform_0(%arg0: i32) -> (i32, i32, i32) {
    %c0_i32 = arith.constant 0 : i32
    %c0_i32_0 = arith.constant 0 : i32
    %c0_i32_1 = arith.constant 0 : i32
    return %arg0, %c0_i32, %c0_i32_0 : i32, i32, i32
  }
  func.func @transform_1(%arg0: i32) -> (i32, i32) {
    %c0_i32 = arith.constant 0 : i32
    %c0_i32_0 = arith.constant 0 : i32
    %c0_i32_1 = arith.constant 0 : i32
    return %c0_i32, %c0_i32_0 : i32, i32
  }
  func.func @transform_2(%arg0: i32) -> (i32, i32) {
    %c0_i32 = arith.constant 0 : i32
    %c0_i32_0 = arith.constant 0 : i32
    %c0_i32_1 = arith.constant 0 : i32
    return %c0_i32, %c0_i32_0 : i32, i32
  }
  func.func @transform_3(%arg0: i32) -> (i32, i32) {
    %c0_i32 = arith.constant 0 : i32
    %c0_i32_0 = arith.constant 0 : i32
    %c0_i32_1 = arith.constant 0 : i32
    return %c0_i32, %c0_i32_0 : i32, i32
  }
  func.func @transform_4(%arg0: i32) -> (i32, i32) {
    %c0_i32 = arith.constant 0 : i32
    %c0_i32_0 = arith.constant 0 : i32
    %c0_i32_1 = arith.constant 0 : i32
    return %c0_i32, %c0_i32_0 : i32, i32
  }
  func.func @transform_5(%arg0: i32) -> (i32, i32) {
    %c0_i32 = arith.constant 0 : i32
    %c0_i32_0 = arith.constant 0 : i32
    %c0_i32_1 = arith.constant 0 : i32
    return %c0_i32, %c0_i32_0 : i32, i32
  }
  func.func @transform_6(%arg0: i32) -> (i32, i32) {
    %c0_i32 = arith.constant 0 : i32
    %c0_i32_0 = arith.constant 0 : i32
    %c0_i32_1 = arith.constant 0 : i32
    return %c0_i32, %c0_i32_0 : i32, i32
  }
  func.func @transform_7(%arg0: i32) -> (i32, i32, i32) {
    %c0_i32 = arith.constant 0 : i32
    %c0_i32_0 = arith.constant 0 : i32
    %c0_i32_1 = arith.constant 0 : i32
    return %arg0, %c0_i32, %c0_i32_0 : i32, i32, i32
  }
}

</mosaic_0001>

<bundles_post_ra>
// kernel: tpu_custom_call.1
= control target key start
LH: loop header
LB: loop body
LE: loop exit
PB: predicated region body
PF: predicated region fallthrough
CT: control target
= control target key end

     0   :  { %12 = vsyncpa [#allocation3], 0  ;;  %s1087_s0 = inlined_call_operand.hbm [shape: f32[2,16,128], index: 0, kind: input, shape index: {}]   ;;  %s1088_s1 = inlined_call_operand.hbm [shape: f32[384,128], index: 1, kind: input, shape index: {}]   ;;  %s1089_s2 = inlined_call_operand.hbm [shape: f32[384,128], index: 2, kind: input, shape index: {}]   ;;  %s1090_s3 = inlined_call_operand.vmem [shape: f32[1,128], index: 3, kind: input, shape index: {}]   ;;  %s1091_s4 = inlined_call_operand.vmem [shape: f32[1,128], index: 4, kind: input, shape index: {}]   ;;  %s1092_s5 = inlined_call_operand.vmem [shape: f32[1,128], index: 5, kind: input, shape index: {}]   ;;  %s1093_s6 = inlined_call_operand.vmem [shape: f32[1,128], index: 6, kind: input, shape index: {}]   ;;  %s1094_s7 = inlined_call_operand.hbm [shape: f32[2,16,128], index: 7, kind: output, shape index: {}]  }
   0x1   :  { %13 = vsyncpa [#allocation6], 0 }
   0x2   :  { %14 = vsyncpa [#allocation4], 0  ;;  %s956_s24 = smov [#allocation5]   ;;  %s957_s26 = smov [#allocation2]  }
   0x3   :  { %s32_s25 = sshll.u32 %s956_s24, 4  ;;  %s20_s27 = sshll.u32 %s957_s26, 4  ;;  %s33_s25 = int_to_ptr.vmem [resolvable:$true] %s32_s25  ;;  %s21_s27 = int_to_ptr.vmem [resolvable:$true] %s20_s27 }
   0x4   :  { %s878_s28 = scalar_lea.vmem %s33_s25, 6144  ;;  %p883_p1 = scmp.lt.s32.totalorder %s33_s25, %s33_s25 }
   0x5   :  { %p879_p0 = scmp.ne.s32.totalorder %s33_s25, %s878_s28  ;;  %p884_p2 = scmp.lt.s32.totalorder %s878_s28, %s878_s28 }
   0x7   :  { %p885_p3 = por %p884_p2, %p883_p1 }
   0x9   :  { %p886_p4 = pnand %p885_p3, %p879_p0 }
   0xb   :  { %889 = shalt.err (!%p886_p4)
}
   0xc   :  { %s958_s29 = smov 128   ;;  %s959_s30 = smov 8  }
   0xd   :  { %38 = dma.hbm_to_vmem [thread:$0]  %s1088_s1, 6144, %s33_s25, [#allocation6], %s958_s29, %s958_s29, %s959_s30  }
   0xe   :  { %s898_s10 = scalar_lea.vmem %s21_s27, 512  ;;  %p903_p6 = scmp.lt.s32.totalorder %s21_s27, %s21_s27 }
   0xf   :  { %p899_p5 = scmp.ne.s32.totalorder %s21_s27, %s898_s10  ;;  %p904_p7 = scmp.lt.s32.totalorder %s898_s10, %s898_s10 }
  0x11   :  { %p905_p8 = por %p904_p7, %p903_p6 }
  0x13   :  { %p906_p9 = pnand %p905_p8, %p899_p5 }
  0x15   :  { %909 = shalt.err (!%p906_p9)
}
  0x16   :  { %26 = dma.hbm_to_vmem [thread:$0]  %s1087_s0, 512, %s21_s27, [#allocation3], %s958_s29, %s958_s29, %s959_s30  }
  0x17   :  { %s960_s13 = smov [#allocation7]  }
  0x18   :  { %s44_s14 = sshll.u32 %s960_s13, 4  ;;  %s45_s14 = int_to_ptr.vmem [resolvable:$true] %s44_s14 }
  0x19   :  { %s918_s15 = scalar_lea.vmem %s45_s14, 6144  ;;  %p923_p11 = scmp.lt.s32.totalorder %s45_s14, %s45_s14 }
  0x1a   :  { %p919_p10 = scmp.ne.s32.totalorder %s45_s14, %s918_s15  ;;  %p924_p12 = scmp.lt.s32.totalorder %s918_s15, %s918_s15 }
  0x1c   :  { %p925_p13 = por %p924_p12, %p923_p11 }
  0x1e   :  { %p926_p0 = pnand %p925_p13, %p919_p10 }
  0x20   :  { %929 = shalt.err (!%p926_p0)
}
  0x21   :  { %50 = dma.hbm_to_vmem [thread:$0]  %s1089_s2, 6144, %s45_s14, [#allocation6], %s958_s29, %s958_s29, %s959_s30  }
  0x22   :  { %950 = dma.done.wait [#allocation3], 512  }
  0x23   :  { %951 = vsyncadd [#allocation3], 4294966784 }
  0x24   :  { %952 = dma.done.wait [#allocation6], 12288  }
  0x25   :  { %953 = vsyncadd [#allocation6], 4294955008  ;;  %v137_v0 = vld [vmem:[#allocation5 + $0xf8] sm:$0xff]  ;;  %v136_v3 = vld [vmem:[#allocation5 + $0xf0] sm:$0xff]  ;;  %vm80_vm0 = vcmask 1040384   ;;  %vm93_vm1 = vcmask 1046528  }
  0x26   :  { %v121_v1 = vld [vmem:[#allocation5 + $0x78] sm:$0xff]  ;;  %660 = vmatprep.subr.mxu0 %v137_v0  ;;  %v120_v4 = vld [vmem:[#allocation5 + $0x70] sm:$0xff]  ;;  %v135_v6 = vld [vmem:[#allocation5 + $0xe8] sm:$0xff] }
  0x27   :  { %v153_v2 = vld [vmem:[#allocation5 + $0x178] sm:$0xff]  ;;  %v152_v5 = vld [vmem:[#allocation5 + $0x170] sm:$0xff]  ;;  %661 = vmatpush3.msra.mxu0 %v121_v1  ;;  %v151_v7 = vld [vmem:[#allocation5 + $0x168] sm:$0xff] }
  0x28   :  { %788 = vmatprep.subr.mxu1 %v153_v2  ;;  %662 = vmatprep.subr.mxu0 %v136_v3  ;;  %v119_v8 = vld [vmem:[#allocation5 + $0x68] sm:$0xff]  ;;  %v134_v9 = vld [vmem:[#allocation5 + $0xe0] sm:$0xff]  ;;  %v133_v12 = vld [vmem:[#allocation5 + $0xd8] sm:$0xff] }
  0x29   :  { %789 = vmatpush3.msra.mxu1 %v153_v2  ;;  %663 = vmatpush3.msra.mxu0 %v120_v4  ;;  %v150_v10 = vld [vmem:[#allocation5 + $0x160] sm:$0xff]  ;;  %v149_v13 = vld [vmem:[#allocation5 + $0x158] sm:$0xff]  ;;  %v132_v15 = vld [vmem:[#allocation5 + $0xd0] sm:$0xff] }
  0x2a   :  { %790 = vmatprep.subr.mxu1 %v152_v5  ;;  %664 = vmatprep.subr.mxu0 %v135_v6  ;;  %v118_v11 = vld [vmem:[#allocation5 + $0x60] sm:$0xff]  ;;  %v117_v14 = vld [vmem:[#allocation5 + $0x58] sm:$0xff]  ;;  %v148_v16 = vld [vmem:[#allocation5 + $0x150] sm:$0xff] }
  0x2b   :  { %791 = vmatpush3.msra.mxu1 %v152_v5  ;;  %665 = vmatpush3.msra.mxu0 %v119_v8  ;;  %v116_v17 = vld [vmem:[#allocation5 + $0x50] sm:$0xff]  ;;  %v131_v18 = vld [vmem:[#allocation5 + $0xc8] sm:$0xff]  ;;  %v130_v21 = vld [vmem:[#allocation5 + $0xc0] sm:$0xff] }
  0x2c   :  { %792 = vmatprep.subr.mxu1 %v151_v7  ;;  %666 = vmatprep.subr.mxu0 %v134_v9  ;;  %v147_v19 = vld [vmem:[#allocation5 + $0x148] sm:$0xff]  ;;  %v146_v22 = vld [vmem:[#allocation5 + $0x140] sm:$0xff]  ;;  %v129_v24 = vld [vmem:[#allocation5 + $0xb8] sm:$0xff] }
  0x2d   :  { %793 = vmatpush3.msra.mxu1 %v151_v7  ;;  %667 = vmatpush3.msra.mxu0 %v118_v11  ;;  %v115_v20 = vld [vmem:[#allocation5 + $0x48] sm:$0xff]  ;;  %v114_v23 = vld [vmem:[#allocation5 + $0x40] sm:$0xff]  ;;  %v145_v25 = vld [vmem:[#allocation5 + $0x138] sm:$0xff] }
  0x2e   :  { %794 = vmatprep.subr.mxu1 %v150_v10  ;;  %668 = vmatprep.subr.mxu0 %v133_v12  ;;  %v113_v26 = vld [vmem:[#allocation5 + $0x38] sm:$0xff]  ;;  %v128_v27 = vld [vmem:[#allocation5 + $0xb0] sm:$0xff]  ;;  %v127_v30 = vld [vmem:[#allocation5 + $0xa8] sm:$0xff] }
  0x2f   :  { %795 = vmatpush3.msra.mxu1 %v150_v10  ;;  %669 = vmatpush3.msra.mxu0 %v117_v14  ;;  %v144_v28 = vld [vmem:[#allocation5 + $0x130] sm:$0xff]  ;;  %v143_v31 = vld [vmem:[#allocation5 + $0x128] sm:$0xff]  ;;  %v126_v33 = vld [vmem:[#allocation5 + $0xa0] sm:$0xff] }
  0x30   :  { %796 = vmatprep.subr.mxu1 %v149_v13  ;;  %670 = vmatprep.subr.mxu0 %v132_v15  ;;  %v112_v29 = vld [vmem:[#allocation5 + $0x30] sm:$0xff]  ;;  %v111_v32 = vld [vmem:[#allocation5 + $0x28] sm:$0xff]  ;;  %v142_v34 = vld [vmem:[#allocation5 + $0x120] sm:$0xff] }
  0x31   :  { %797 = vmatpush3.msra.mxu1 %v149_v13  ;;  %671 = vmatpush3.msra.mxu0 %v116_v17  ;;  %v110_v35 = vld [vmem:[#allocation5 + $0x20] sm:$0xff]  ;;  %v125_v36 = vld [vmem:[#allocation5 + $0x98] sm:$0xff]  ;;  %v124_v39 = vld [vmem:[#allocation5 + $0x90] sm:$0xff] }
  0x32   :  { %798 = vmatprep.subr.mxu1 %v148_v16  ;;  %672 = vmatprep.subr.mxu0 %v131_v18  ;;  %v141_v37 = vld [vmem:[#allocation5 + $0x118] sm:$0xff]  ;;  %v140_v40 = vld [vmem:[#allocation5 + $0x110] sm:$0xff]  ;;  %v1020_v41 = vld [vmem:[#allocation2] sm:$0xff] }
  0x33   :  { %799 = vmatpush3.msra.mxu1 %v148_v16  ;;  %673 = vmatpush3.msra.mxu0 %v115_v20  ;;  %v109_v38 = vld [vmem:[#allocation5 + $0x18] sm:$0xff]  ;;  %v1022_v42 = vld [vmem:[#allocation2 + $0x8] sm:$0xff]  ;;  %v108_v43 = vld [vmem:[#allocation5 + $0x10] sm:$0xff]  ;;  %v94_v49 = vrot.slane %v1020_v41, 1  ;;  %v81_v54 = vrot.slane %v1020_v41, 7 }
  0x34   :  { %800 = vmatprep.subr.mxu1 %v147_v19  ;;  %674 = vmatprep.subr.mxu0 %v130_v21  ;;  %v123_v44 = vld [vmem:[#allocation5 + $0x88] sm:$0xff]  ;;  %v1024_v46 = vld [vmem:[#allocation2 + $0x10] sm:$0xff]  ;;  %v1026_v47 = vld [vmem:[#allocation2 + $0x18] sm:$0xff]  ;;  %v95_v50 = vrot.slane %v1022_v42, 1  ;;  %v82_v58 = vrot.slane %v1022_v42, 7 }
  0x35   :  { %801 = vmatpush3.msra.mxu1 %v147_v19  ;;  %675 = vmatpush3.msra.mxu0 %v114_v23  ;;  %v139_v45 = vld [vmem:[#allocation5 + $0x108] sm:$0xff]  ;;  %v122_v51 = vld [vmem:[#allocation5 + $0x80] sm:$0xff]  ;;  %v97_v55 = vrot.slane %v1024_v46, 1  ;;  %v98_v56 = vrot.slane %v1026_v47, 1  ;;  %vm1034_vm2 = vmneg %vm80_vm0  ;;  %v84_v3 = vrot.slane %v1024_v46, 7  ;;  %v85_v6 = vrot.slane %v1026_v47, 7 }
  0x36   :  { %802 = vmatprep.subr.mxu1 %v146_v22  ;;  %676 = vmatprep.subr.mxu0 %v129_v24  ;;  %v107_v48 = vld [vmem:[#allocation5 + $0x8] sm:$0xff]  ;;  %v106_v52 = vld [vmem:[#allocation5] sm:$0xff]  ;;  %v96_v59 = vsel %vm93_vm1, %v94_v49, %v95_v50  ;;  %v407_v60 = vld [vmem:[#allocation7 + $0xf8] sm:$0xff]  ;;  %v83_v63 = vsel %vm80_vm0, %v81_v54, %v82_v58 }
  0x37   :  { %803 = vmatpush3.msra.mxu1 %v146_v22  ;;  %677 = vmatpush3.msra.mxu0 %v113_v26  ;;  %v138_v53 = vld [vmem:[#allocation5 + $0x100] sm:$0xff]  ;;  %v99_v61 = vsel %vm93_vm1, %v97_v55, %v98_v56  ;;  %v391_v62 = vld [vmem:[#allocation7 + $0x78] sm:$0xff]  ;;  %v406_v0 = vld [vmem:[#allocation7 + $0xf0] sm:$0xff]  ;;  %v86_v12 = vsel %vm80_vm0, %v84_v3, %v85_v6 }
  0x38   :  { %804 = vmatprep.subr.mxu1 %v145_v25  ;;  %678 = vmatprep.subr.mxu0 %v128_v27  ;;  %v390_v1 = vld [vmem:[#allocation7 + $0x70] sm:$0xff]  ;;  %v405_v2 = vld [vmem:[#allocation7 + $0xe8] sm:$0xff]  ;;  %v423_v5 = vld [vmem:[#allocation7 + $0x178] sm:$0xff] }
  0x39   :  { %805 = vmatpush3.msra.mxu1 %v145_v25  ;;  %679 = vmatpush3.msra.mxu0 %v112_v29  ;;  %v389_v4 = vld [vmem:[#allocation7 + $0x68] sm:$0xff]  ;;  %v404_v7 = vld [vmem:[#allocation7 + $0xe0] sm:$0xff]  ;;  %v403_v9 = vld [vmem:[#allocation7 + $0xd8] sm:$0xff] }
  0x3a   :  { %806 = vmatprep.subr.mxu1 %v144_v28  ;;  %680 = vmatprep.subr.mxu0 %v127_v30  ;;  %v388_v8 = vld [vmem:[#allocation7 + $0x60] sm:$0xff]  ;;  %v422_v10 = vld [vmem:[#allocation7 + $0x170] sm:$0xff]  ;;  %v387_v11 = vld [vmem:[#allocation7 + $0x58] sm:$0xff] }
  0x3b   :  { %807 = vmatpush3.msra.mxu1 %v144_v28  ;;  %681 = vmatpush3.msra.mxu0 %v111_v32  ;;  %v402_v13 = vld [vmem:[#allocation7 + $0xd0] sm:$0xff]  ;;  %v421_v14 = vld [vmem:[#allocation7 + $0x168] sm:$0xff]  ;;  %v420_v17 = vld [vmem:[#allocation7 + $0x160] sm:$0xff] }
  0x3c   :  { %808 = vmatprep.subr.mxu1 %v143_v31  ;;  %682 = vmatprep.subr.mxu0 %v126_v33  ;;  %v386_v15 = vld [vmem:[#allocation7 + $0x50] sm:$0xff]  ;;  %v401_v16 = vld [vmem:[#allocation7 + $0xc8] sm:$0xff]  ;;  %v400_v19 = vld [vmem:[#allocation7 + $0xc0] sm:$0xff] }
  0x3d   :  { %809 = vmatpush3.msra.mxu1 %v143_v31  ;;  %683 = vmatpush3.msra.mxu0 %v110_v35  ;;  %v385_v18 = vld [vmem:[#allocation7 + $0x48] sm:$0xff]  ;;  %v419_v20 = vld [vmem:[#allocation7 + $0x158] sm:$0xff]  ;;  %v384_v21 = vld [vmem:[#allocation7 + $0x40] sm:$0xff] }
  0x3e   :  { %810 = vmatprep.subr.mxu1 %v142_v34  ;;  %684 = vmatprep.subr.mxu0 %v125_v36  ;;  %v399_v22 = vld [vmem:[#allocation7 + $0xb8] sm:$0xff]  ;;  %v418_v23 = vld [vmem:[#allocation7 + $0x150] sm:$0xff]  ;;  %v417_v26 = vld [vmem:[#allocation7 + $0x148] sm:$0xff] }
  0x3f   :  { %811 = vmatpush3.msra.mxu1 %v142_v34  ;;  %685 = vmatpush3.msra.mxu0 %v109_v38  ;;  %v383_v24 = vld [vmem:[#allocation7 + $0x38] sm:$0xff]  ;;  %v398_v25 = vld [vmem:[#allocation7 + $0xb0] sm:$0xff]  ;;  %v397_v28 = vld [vmem:[#allocation7 + $0xa8] sm:$0xff] }
  0x40   :  { %812 = vmatprep.subr.mxu1 %v141_v37  ;;  %686 = vmatprep.subr.mxu0 %v124_v39  ;;  %v382_v27 = vld [vmem:[#allocation7 + $0x30] sm:$0xff]  ;;  %v416_v29 = vld [vmem:[#allocation7 + $0x140] sm:$0xff]  ;;  %v381_v30 = vld [vmem:[#allocation7 + $0x28] sm:$0xff] }
  0x41   :  { %813 = vmatpush3.msra.mxu1 %v141_v37  ;;  %687 = vmatpush3.msra.mxu0 %v108_v43  ;;  %v396_v31 = vld [vmem:[#allocation7 + $0xa0] sm:$0xff]  ;;  %v415_v32 = vld [vmem:[#allocation7 + $0x138] sm:$0xff]  ;;  %v414_v35 = vld [vmem:[#allocation7 + $0x130] sm:$0xff] }
  0x42   :  { %814 = vmatprep.subr.mxu1 %v140_v40  ;;  %688 = vmatprep.subr.mxu0 %v123_v44  ;;  %v380_v33 = vld [vmem:[#allocation7 + $0x20] sm:$0xff]  ;;  %v395_v34 = vld [vmem:[#allocation7 + $0x98] sm:$0xff]  ;;  %v394_v37 = vld [vmem:[#allocation7 + $0x90] sm:$0xff] }
  0x43   :  { %815 = vmatpush3.msra.mxu1 %v140_v40  ;;  %689 = vmatpush3.msra.mxu0 %v107_v48  ;;  %v379_v36 = vld [vmem:[#allocation7 + $0x18] sm:$0xff]  ;;  %v413_v38 = vld [vmem:[#allocation7 + $0x128] sm:$0xff]  ;;  %v378_v39 = vld [vmem:[#allocation7 + $0x10] sm:$0xff] }
  0x44   :  { %816 = vmatprep.subr.mxu1 %v139_v45  ;;  %690 = vmatprep.subr.mxu0 %v122_v51  ;;  %v393_v40 = vld [vmem:[#allocation7 + $0x88] sm:$0xff]  ;;  %v412_v43 = vld [vmem:[#allocation7 + $0x120] sm:$0xff]  ;;  %v411_v48 = vld [vmem:[#allocation7 + $0x118] sm:$0xff] }
  0x45   :  { %817 = vmatpush3.msra.mxu1 %v139_v45  ;;  %218 = vmatprep.mubr.f32.mxu0 %v1020_v41  ;;  %v377_v44 = vld [vmem:[#allocation7 + $0x8] sm:$0xff]  ;;  %v392_v45 = vld [vmem:[#allocation7 + $0x80] sm:$0xff] }
  0x46   :  { %691 = vmatpush3.msra.mxu0 %v106_v52  ;;  %818 = vmatprep.subr.mxu1 %v138_v53  ;;  %v376_v49 = vld [vmem:[#allocation7] sm:$0xff]  ;;  %v409_v51 = vld [vmem:[#allocation7 + $0x108] sm:$0xff] }
  0x47   :  { %645 = vmatmul.mubr.msk.f32.vlgmr.msra.gmra.mxu0 %vm1034_vm2, %v81_v54  ;;  %819 = vmatpush3.msra.mxu1 %v138_v53  ;;  %v408_v52 = vld [vmem:[#allocation7 + $0x100] sm:$0xff] }
  0x48   :  { %820 = vmatprep.mubr.f32.mxu1 %v96_v59  ;;  %223 = vmatprep.mubr.f32.mxu0 %v1022_v42  ;;  %v650_v58 = vld [vmem:[%s1090_s3] ss:$0 sm:$0xff] }
  0x49   :  { %821 = vmatmul.mubr.msk.f32.vlgmr.msra.gmra.mxu1 %vm93_vm1, %v95_v50  ;;  %724 = vmatprep.subr.mxu0 %v407_v60  ;;  %v410_v50 = vld [vmem:[#allocation7 + $0x110] sm:$0xff]  ;;  %v658_v57 = vld [vmem:[%s1092_s5] ss:$0 sm:$0xff]  ;;  %s961_s5 = smov [#allocation8]  }
  0x4a   :  { %823 = vmatprep.mubr.f32.mxu1 %v99_v61  ;;  %725 = vmatpush3.msra.mxu0 %v391_v62 }
  0x4b   :  { %224 = vmatmul.mubr.f32.gmra.mxu0 %v83_v63  ;;  %726 = vmatprep.subr.mxu0 %v406_v0  ;;  %v651_v0 = vld [vmem:[%s1091_s4] ss:$0 sm:$0xff] }
  0x4c   :  { %228 = vmatprep.mubr.f32.mxu0 %v1024_v46  ;;  %727 = vmatpush3.msra.mxu0 %v390_v1 }
  0x4d   :  { %824 = vmatmul.mubr.msk.f32.gmra.mxu1 %vm93_vm1, %v98_v56  ;;  %728 = vmatprep.subr.mxu0 %v405_v2 }
  0x4e   :  { %729 = vmatpush3.msra.mxu0 %v389_v4  ;;  %826 = vmatprep.subr.mxu1 %v423_v5 }
  0x4f   :  { %647 = vmatmul.mubr.msk.f32.gmra.mxu0 %vm1034_vm2, %v84_v3  ;;  %730 = vmatprep.subr.mxu0 %v404_v7 }
  0x50   :  { %233 = vmatprep.mubr.f32.mxu0 %v1026_v47  ;;  %731 = vmatpush3.msra.mxu0 %v388_v8 }
  0x51   :  { %827 = vmatpush3.msra.mxu1 %v423_v5  ;;  %732 = vmatprep.subr.mxu0 %v403_v9 }
  0x52   :  { %828 = vmatprep.subr.mxu1 %v422_v10  ;;  %733 = vmatpush3.msra.mxu0 %v387_v11 }
  0x53   :  { %234 = vmatmul.mubr.f32.gmra.mxu0 %v86_v12  ;;  %829 = vmatpush3.msra.mxu1 %v422_v10 }
  0x54   :  { %734 = vmatprep.subr.mxu0 %v402_v13  ;;  %830 = vmatprep.subr.mxu1 %v421_v14 }
  0x55   :  { %735 = vmatpush3.msra.mxu0 %v386_v15  ;;  %831 = vmatpush3.msra.mxu1 %v421_v14 }
  0x56   :  { %736 = vmatprep.subr.mxu0 %v401_v16  ;;  %832 = vmatprep.subr.mxu1 %v420_v17 }
  0x57   :  { %737 = vmatpush3.msra.mxu0 %v385_v18  ;;  %833 = vmatpush3.msra.mxu1 %v420_v17 }
  0x58   :  { %738 = vmatprep.subr.mxu0 %v400_v19  ;;  %834 = vmatprep.subr.mxu1 %v419_v20 }
  0x59   :  { %739 = vmatpush3.msra.mxu0 %v384_v21  ;;  %835 = vmatpush3.msra.mxu1 %v419_v20 }
  0x5a   :  { %740 = vmatprep.subr.mxu0 %v399_v22  ;;  %836 = vmatprep.subr.mxu1 %v418_v23 }
  0x5b   :  { %837 = vmatpush3.msra.mxu1 %v418_v23  ;;  %741 = vmatpush3.msra.mxu0 %v383_v24 }
  0x5c   :  { %742 = vmatprep.subr.mxu0 %v398_v25  ;;  %838 = vmatprep.subr.mxu1 %v417_v26 }
  0x5d   :  { %743 = vmatpush3.msra.mxu0 %v382_v27  ;;  %839 = vmatpush3.msra.mxu1 %v417_v26 }
  0x5e   :  { %744 = vmatprep.subr.mxu0 %v397_v28  ;;  %840 = vmatprep.subr.mxu1 %v416_v29 }
  0x5f   :  { %745 = vmatpush3.msra.mxu0 %v381_v30  ;;  %841 = vmatpush3.msra.mxu1 %v416_v29 }
  0x60   :  { %746 = vmatprep.subr.mxu0 %v396_v31  ;;  %842 = vmatprep.subr.mxu1 %v415_v32 }
  0x61   :  { %747 = vmatpush3.msra.mxu0 %v380_v33  ;;  %843 = vmatpush3.msra.mxu1 %v415_v32 }
  0x62   :  { %748 = vmatprep.subr.mxu0 %v395_v34  ;;  %844 = vmatprep.subr.mxu1 %v414_v35 }
  0x63   :  { %749 = vmatpush3.msra.mxu0 %v379_v36  ;;  %845 = vmatpush3.msra.mxu1 %v414_v35 }
  0x64   :  { %750 = vmatprep.subr.mxu0 %v394_v37  ;;  %846 = vmatprep.subr.mxu1 %v413_v38 }
  0x65   :  { %751 = vmatpush3.msra.mxu0 %v378_v39  ;;  %847 = vmatpush3.msra.mxu1 %v413_v38 }
  0x66   :  { %752 = vmatprep.subr.mxu0 %v393_v40  ;;  %848 = vmatprep.subr.mxu1 %v412_v43 }
  0x67   :  { %753 = vmatpush3.msra.mxu0 %v377_v44  ;;  %849 = vmatpush3.msra.mxu1 %v412_v43 }
  0x68   :  { %754 = vmatprep.subr.mxu0 %v392_v45  ;;  %850 = vmatprep.subr.mxu1 %v411_v48 }
  0x69   :  { %755 = vmatpush3.msra.mxu0 %v376_v49  ;;  %851 = vmatpush3.msra.mxu1 %v411_v48 }
  0x6a   :  { %852 = vmatprep.subr.mxu1 %v410_v50 }
  0x6b   :  { %853 = vmatpush3.msra.mxu1 %v410_v50  ;;  %v659_v50 = vld [vmem:[%s1093_s6] ss:$0 sm:$0xff]  ;;  %s631_s6 = sshll.u32 %s961_s5, 4  ;;  %s632_s6 = int_to_ptr.vmem [resolvable:$true] %s631_s6 }
  0x6c   :  { %854 = vmatprep.subr.mxu1 %v409_v51  ;;  %s930_s21 = scalar_lea.vmem %s632_s6, 512  ;;  %p935_p2 = scmp.lt.s32.totalorder %s632_s6, %s632_s6 }
  0x6d   :  { %855 = vmatpush3.msra.mxu1 %v409_v51  ;;  %p931_p1 = scmp.ne.s32.totalorder %s632_s6, %s930_s21  ;;  %p936_p3 = scmp.lt.s32.totalorder %s930_s21, %s930_s21 }
  0x6e   :  { %856 = vmatprep.subr.mxu1 %v408_v52 }
  0x6f   :  { %857 = vmatpush3.msra.mxu1 %v408_v52  ;;  %p937_p4 = por %p936_p3, %p935_p2 }
  0x71   :  { %p938_p5 = pnand %p937_p4, %p931_p1 }
 0x107   :  { %v692_v53 = vpop.f32.mrf.mxu0 }
 0x109   :  { %v822_v54 = vpop.f32.mrf.mxu1  ;;  %v693_v55 = vpop.f32.mrf.mxu0 }
 0x10a   :  { %v694_v56 = vadd.f32 %v693_v55, %v692_v53 }
 0x10b   :  { %v305_v59 = vpop.f32.mrf.mxu1  ;;  %v695_v60 = vpop.f32.mrf.mxu0 }
 0x10c   :  { %v306_v61 = vadd.f32 %v694_v56, %v305_v59 }
 0x10d   :  { %v696_v62 = vpop.f32.mrf.mxu0  ;;  %v825_v63 = vpop.f32.mrf.mxu1 }
 0x10e   :  { %v330_v1 = vmul.f32 %v650_v58, %v306_v61  ;;  %v697_v2 = vadd.f32 %v696_v62, %v695_v60 }
 0x10f   :  { %v698_v3 = vpop.f32.mrf.mxu0  ;;  %v315_v7 = vpop.f32.mrf.mxu1 }
 0x110   :  { %v311_v4 = vadd.f32 %v822_v54, %v697_v2  ;;  %v340_v5 = vadd.f32 %v651_v0, %v330_v1 }
 0x111   :  { %v699_v6 = vpop.f32.mrf.mxu0 }
 0x112   :  { %v331_v8 = vmul.f32 %v650_v58, %v311_v4  ;;  %v700_v9 = vadd.f32 %v699_v6, %v698_v3  ;;  %v344_v10 = vmax.f32 %v340_v5, 0.0 }
 0x113   :  { %v701_v11 = vpop.f32.mrf.mxu0 }
 0x114   :  { %v316_v12 = vadd.f32 %v700_v9, %v315_v7  ;;  %v352_v13 = vrot.slane %v344_v10, 7  ;;  %488 = vmatprep.mubr.f32.mxu0 %v344_v10  ;;  %v341_v14 = vadd.f32 %v651_v0, %v331_v8  ;;  %v364_v19 = vrot.slane %v344_v10, 1 }
 0x115   :  { %v702_v15 = vpop.f32.mrf.mxu0 }
 0x116   :  { %v332_v16 = vmul.f32 %v650_v58, %v316_v12  ;;  %v703_v17 = vadd.f32 %v702_v15, %v701_v11  ;;  %653 = vmatmul.mubr.msk.f32.vlgmr.msra.gmra.mxu0 %vm1034_vm2, %v352_v13  ;;  %v345_v18 = vmax.f32 %v341_v14, 0.0 }
 0x118   :  { %v321_v20 = vadd.f32 %v825_v63, %v703_v17  ;;  %493 = vmatprep.mubr.f32.mxu0 %v345_v18  ;;  %v353_v21 = vrot.slane %v345_v18, 7  ;;  %v365_v22 = vrot.slane %v345_v18, 1  ;;  %v342_v23 = vadd.f32 %v651_v0, %v332_v16 }
 0x11a   :  { %v333_v24 = vmul.f32 %v650_v58, %v321_v20  ;;  %v354_v25 = vsel %vm80_vm0, %v352_v13, %v353_v21  ;;  %v366_v26 = vsel %vm93_vm1, %v364_v19, %v365_v22  ;;  %v346_v27 = vmax.f32 %v342_v23, 0.0 }
 0x11b   :  { %494 = vmatmul.mubr.f32.gmra.mxu0 %v354_v25  ;;  %858 = vmatprep.mubr.f32.mxu1 %v366_v26 }
 0x11c   :  { %498 = vmatprep.mubr.f32.mxu0 %v346_v27  ;;  %859 = vmatmul.mubr.msk.f32.vlgmr.msra.gmra.mxu1 %vm93_vm1, %v365_v22  ;;  %v355_v28 = vrot.slane %v346_v27, 7  ;;  %v343_v29 = vadd.f32 %v651_v0, %v333_v24  ;;  %v367_v32 = vrot.slane %v346_v27, 1 }
 0x11e   :  { %v347_v30 = vmax.f32 %v343_v29, 0.0 }
 0x11f   :  { %655 = vmatmul.mubr.msk.f32.gmra.mxu0 %vm1034_vm2, %v355_v28 }
 0x120   :  { %503 = vmatprep.mubr.f32.mxu0 %v347_v30  ;;  %v356_v31 = vrot.slane %v347_v30, 7  ;;  %v368_v33 = vrot.slane %v347_v30, 1 }
 0x122   :  { %v357_v34 = vsel %vm80_vm0, %v355_v28, %v356_v31  ;;  %v369_v35 = vsel %vm93_vm1, %v367_v32, %v368_v33 }
 0x123   :  { %504 = vmatmul.mubr.f32.gmra.mxu0 %v357_v34  ;;  %861 = vmatprep.mubr.f32.mxu1 %v369_v35 }
 0x124   :  { %862 = vmatmul.mubr.msk.f32.gmra.mxu1 %vm93_vm1, %v368_v33 }
 0x1d6   :  { %v756_v36 = vpop.f32.mrf.mxu0 }
 0x1d8   :  { %v757_v37 = vpop.f32.mrf.mxu0 }
 0x1d9   :  { %v758_v40 = vadd.f32 %v757_v37, %v756_v36 }
 0x1db   :  { %v759_v38 = vpop.f32.mrf.mxu0 }
 0x1dc   :  { %v860_v39 = vpop.f32.mrf.mxu1 }
 0x1dd   :  { %v760_v43 = vpop.f32.mrf.mxu0 }
 0x1de   :  { %v761_v44 = vadd.f32 %v760_v43, %v759_v38  ;;  %v575_v45 = vpop.f32.mrf.mxu1 }
 0x1df   :  { %v576_v48 = vadd.f32 %v758_v40, %v575_v45  ;;  %v762_v49 = vpop.f32.mrf.mxu0 }
 0x1e0   :  { %v581_v51 = vadd.f32 %v860_v39, %v761_v44 }
 0x1e1   :  { %v600_v52 = vmul.f32 %v658_v57, %v576_v48  ;;  %v763_v53 = vpop.f32.mrf.mxu0 }
 0x1e2   :  { %v601_v54 = vmul.f32 %v658_v57, %v581_v51  ;;  %v764_v61 = vadd.f32 %v763_v53, %v762_v49 }
 0x1e3   :  { %v610_v55 = vadd.f32 %v659_v50, %v600_v52  ;;  %v765_v56 = vpop.f32.mrf.mxu0 }
 0x1e4   :  { %v611_v58 = vadd.f32 %v659_v50, %v601_v54  ;;  %v863_v59 = vpop.f32.mrf.mxu1 }
 0x1e5   :  { %v614_v60 = vadd.f32 %v610_v55, %v1020_v41  ;;  %v766_v62 = vpop.f32.mrf.mxu0 }
 0x1e6   :  { %v615_v63 = vadd.f32 %v611_v58, %v1022_v42  ;;  %v767_v0 = vadd.f32 %v766_v62, %v765_v56  ;;  %v585_v1 = vpop.f32.mrf.mxu1 }
 0x1e7   :  { %v618_v2 = vmax.f32 %v614_v60, 0.0  ;;  %v586_v3 = vadd.f32 %v764_v61, %v585_v1 }
 0x1e8   :  { %v619_v4 = vmax.f32 %v615_v63, 0.0  ;;  %v591_v5 = vadd.f32 %v863_v59, %v767_v0 }
 0x1e9   :  { %622 = vst [vmem:[#allocation8] sm:$0xff] %v618_v2  ;;  %v602_v6 = vmul.f32 %v658_v57, %v586_v3 }
 0x1ea   :  { %623 = vst [vmem:[#allocation8 + $0x8] sm:$0xff] %v619_v4  ;;  %v603_v7 = vmul.f32 %v658_v57, %v591_v5 }
 0x1eb   :  { %v612_v8 = vadd.f32 %v659_v50, %v602_v6 }
 0x1ec   :  { %v613_v9 = vadd.f32 %v659_v50, %v603_v7 }
 0x1ed   :  { %v616_v10 = vadd.f32 %v612_v8, %v1024_v46 }
 0x1ee   :  { %v617_v41 = vadd.f32 %v613_v9, %v1026_v47 }
 0x1ef   :  { %v620_v11 = vmax.f32 %v616_v10, 0.0 }
 0x1f0   :  { %v621_v42 = vmax.f32 %v617_v41, 0.0 }
 0x1f1   :  { %624 = vst [vmem:[#allocation8 + $0x10] sm:$0xff] %v620_v11 }
 0x1f2   :  { %625 = vst [vmem:[#allocation8 + $0x18] sm:$0xff] %v621_v42 }
 0x1f3   :  { %941 = shalt.err (!%p938_p5)
}
 0x1f4   :  { %637 = dma.vmem_to_hbm [thread:$0]  %s632_s6, 512, %s1094_s7, [#allocation4], %s958_s29, %s958_s29, %s959_s30  }
 0x1f5   :  { %954 = dma.done.wait [#allocation4], 512  }
 0x1f6   :  { %955 = vsyncadd [#allocation4], 4294966784 }
 0x1f7   :  { %641 = vsyncpa [#allocation3], 1 }
 0x1f8   :  { %642 = vsyncpa [#allocation6], 1 }
 0x1f9   :  { %643 = vsyncpa [#allocation4], 1 }

</bundles_post_ra>
